<compile_context>
chip_gen: v7x
topology: tpu7x:2x2x1
jax: 0.10.0
libtpu: 0.0.40
codegen_flags: <defaults>
</compile_context>

<pallas_src>
import jax
import jax.numpy as jnp
from jax.experimental import pallas as pl
from jax.experimental.pallas import tpu as pltpu


def _round_up(v, m):
    return pl.cdiv(v, m) * m


def convex_diag_normal_kernel(x_ref, w0_ref, b0_ref, wh_ref, bh_ref, slope_ref,
                              out_ref):
    # base_net: Linear + ReLU (MXU matmul, low-precision operands, f32 accumulate).
    h = jnp.dot(x_ref[...], w0_ref[...], preferred_element_type=jnp.float32)
    h = jnp.maximum(h + b0_ref[...], 0.0)

    # Fused head: one lane-dense matmul producing [mu_lin | log_var] in one shot.
    y = jnp.dot(h.astype(wh_ref.dtype), wh_ref[...],
                preferred_element_type=jnp.float32)
    y = y + bh_ref[...]

    # concave_act (LeakyReLU slope=1.5) applied only to the mu lanes via the
    # precomputed per-lane slope vector (1.5 on mu lanes, 1.0 on log_var lanes).
    out_ref[...] = jnp.where(y < 0.0, y * slope_ref[...], y).astype(out_ref.dtype)


def prepare_params(w0, b0, w_mu_raw, b_mu, w_var, b_var,
                   *, compute_dtype=jnp.bfloat16):
    """One-time weight prep: softplus reparam, head fusion, lane padding, cast.

    Call once at param-load time and reuse the result for every forward call.
    """
    d_in, H = w0.shape
    O = w_mu_raw.shape[1]

    # Numerically stable softplus (ReparameterizedLinear weight transform).
    w_mu = jax.nn.softplus(w_mu_raw.astype(jnp.float32))
    w_head = jnp.concatenate([w_mu, w_var.astype(jnp.float32)], axis=1)       # (H, 2O)
    b_head = jnp.concatenate([jnp.reshape(b_mu, (1, -1)),
                              jnp.reshape(b_var, (1, -1))], axis=1).astype(jnp.float32)

    h_p = _round_up(H, 128)
    o2_p = _round_up(2 * O, 128)

    w0_p = jnp.zeros((d_in, h_p), compute_dtype).at[:, :H].set(w0.astype(compute_dtype))
    b0_p = jnp.zeros((1, h_p), jnp.float32).at[:, :H].set(
        jnp.reshape(b0, (1, -1)).astype(jnp.float32))
    wh_p = jnp.zeros((h_p, o2_p), compute_dtype).at[:H, :2 * O].set(
        w_head.astype(compute_dtype))
    bh_p = jnp.zeros((1, o2_p), jnp.float32).at[:, :2 * O].set(b_head)

    # Per-lane LeakyReLU slope: 1.5 on mu lanes, 1.0 elsewhere (incl. padding).
    lane = jnp.arange(o2_p)[None, :]
    slope = jnp.where(lane < O, jnp.float32(1.5), jnp.float32(1.0))

    return dict(w0=w0_p, b0=b0_p, w_head=wh_p, b_head=bh_p, slope=slope,
                d_in=d_in, hidden=H, out_dim=O, h_pad=h_p, o2_pad=o2_p)


def convex_diag_normal_forward(x, params, *, tm=256, out_dtype=jnp.float32,
                               return_padded=False):
    B, d_in = x.shape
    assert d_in == params["d_in"]
    h_p, o2_p, O = params["h_pad"], params["o2_pad"], params["out_dim"]
    compute_dtype = params["w0"].dtype

    # --- batch tiling: multiple-of-8 sublane tiles, no lane-dim padding of x ---
    tm = max(8, _round_up(int(tm), 8))
    b_p = _round_up(B, 8)                   # sublane alignment only
    tm = min(tm, b_p)
    # Keep >=2 grid steps when batch allows, so both v7x TensorCores get work.
    if b_p >= 16 and pl.cdiv(b_p, tm) < 2:
        tm = _round_up(pl.cdiv(b_p, 2), 8)
    grid = (pl.cdiv(b_p, tm),)

    x_c = x.astype(compute_dtype)           # halves streamed x bytes for bf16
    if b_p != B:
        x_c = jnp.zeros((b_p, d_in), compute_dtype).at[:B].set(x_c)

    itemsize_in = jnp.dtype(compute_dtype).itemsize
    itemsize_out = jnp.dtype(out_dtype).itemsize

    resident_bytes = ((params["w0"].size + params["w_head"].size) * itemsize_in
                      + (params["b0"].size + params["b_head"].size
                         + params["slope"].size) * 4)
    stream_bytes = 2 * (tm * d_in * itemsize_in + tm * o2_p * itemsize_out)
    scratch_bytes = tm * h_p * 4 + tm * o2_p * 4
    vmem_limit = int(min(max(2 * (resident_bytes + stream_bytes + scratch_bytes),
                             16 * 1024 * 1024),
                         64 * 1024 * 1024))   # stay within v7x physical VMEM

    cost = pl.CostEstimate(
        flops=2 * b_p * (d_in * h_p + h_p * o2_p),
        transcendentals=0,
        bytes_accessed=(b_p * d_in * itemsize_in + resident_bytes
                        + b_p * o2_p * itemsize_out),
    )

    const = lambda i: (0, 0)
    out = pl.pallas_call(
        convex_diag_normal_kernel,
        out_shape=jax.ShapeDtypeStruct((b_p, o2_p), out_dtype),
        grid_spec=pltpu.PrefetchScalarGridSpec(
            num_scalar_prefetch=0,
            grid=grid,
            in_specs=[
                # x: streamed per batch tile, lane dim = full (unpadded) d_in.
                pl.BlockSpec((tm, d_in), lambda i: (i, 0)),
                # Resident weights/biases/slope: constant index, single buffer.
                pl.BlockSpec((d_in, h_p), const, pipeline_mode=pl.Buffered(1)),
                pl.BlockSpec((1, h_p), const, pipeline_mode=pl.Buffered(1)),
                pl.BlockSpec((h_p, o2_p), const, pipeline_mode=pl.Buffered(1)),
                pl.BlockSpec((1, o2_p), const, pipeline_mode=pl.Buffered(1)),
                pl.BlockSpec((1, o2_p), const, pipeline_mode=pl.Buffered(1)),
            ],
            out_specs=pl.BlockSpec((tm, o2_p), lambda i: (i, 0)),
        ),
        compiler_params=pltpu.CompilerParams(
            dimension_semantics=("parallel",),
            vmem_limit_bytes=vmem_limit,
        ),
        cost_estimate=cost,
    )(x_c, params["w0"], params["b0"], params["w_head"], params["b_head"],
      params["slope"])

    if return_padded:
        return out                       # (b_p, o2_p) lane-dense layout
    return out[:B, :2 * O]


def _reference(x, w0, b0, w_mu_raw, b_mu, w_var, b_var):
    h = jnp.maximum(x @ w0 + b0, 0.0)
    mu_lin = h @ jax.nn.softplus(w_mu_raw) + b_mu
    mu = jnp.where(mu_lin >= 0.0, mu_lin, 1.5 * mu_lin)
    log_var = h @ w_var + b_var
    return jnp.concatenate([mu, log_var], axis=-1)


if __name__ == "__main__":
    # Small deterministic shapes consistent with the module's forward.
    B, D_IN, HIDDEN, OUT = 8, 16, 32, 16

    key = jax.random.PRNGKey(0)
    ks = jax.random.split(key, 7)
    x        = jax.random.normal(ks[0], (B, D_IN),      dtype=jnp.float32)
    w0       = jax.random.normal(ks[1], (D_IN, HIDDEN), dtype=jnp.float32) * 0.1
    b0       = jax.random.normal(ks[2], (1, HIDDEN),    dtype=jnp.float32) * 0.1
    w_mu_raw = jax.random.normal(ks[3], (HIDDEN, OUT),  dtype=jnp.float32) * 0.1
    b_mu     = jax.random.normal(ks[4], (1, OUT),       dtype=jnp.float32) * 0.1
    w_var    = jax.random.normal(ks[5], (HIDDEN, OUT),  dtype=jnp.float32) * 0.1
    b_var    = jax.random.normal(ks[6], (1, OUT),       dtype=jnp.float32) * 0.1

    ref = _reference(x, w0, b0, w_mu_raw, b_mu, w_var, b_var)

    # Production path: bf16 MXU operands (native MXU rate), f32 accumulation.
    params_bf16 = prepare_params(w0, b0, w_mu_raw, b_mu, w_var, b_var)
    out = jax.block_until_ready(convex_diag_normal_forward(x, params_bf16))
    assert out.shape == (B, 2 * OUT), out.shape
    assert jnp.allclose(out, ref, atol=5e-2, rtol=5e-2), "bf16 kernel mismatch vs reference"

    # Exact-precision verification path (f32 operands, same kernel).
    params_f32 = prepare_params(w0, b0, w_mu_raw, b_mu, w_var, b_var,
                                compute_dtype=jnp.float32)
    out_f32 = jax.block_until_ready(convex_diag_normal_forward(x, params_f32))
    assert jnp.allclose(out_f32, ref, atol=1e-3, rtol=1e-3), "f32 kernel mismatch vs reference"

    print("KERNEL_OK")
</pallas_src>

<mosaic_0001>
module attributes {stable_mosaic.version = 11 : i64} {
  func.func @convex_diag_normal_kernel(%arg0: i32, %arg1: memref<8x16xbf16, #tpu.memory_space<vmem>>, %arg2: memref<16x128xbf16, #tpu.memory_space<vmem>>, %arg3: memref<1x128xf32, #tpu.memory_space<vmem>>, %arg4: memref<128x128xbf16, #tpu.memory_space<vmem>>, %arg5: memref<1x128xf32, #tpu.memory_space<vmem>>, %arg6: memref<1x128xf32, #tpu.memory_space<vmem>>, %arg7: memref<8x128xf32, #tpu.memory_space<vmem>>) attributes {dimension_semantics = [#tpu.dimension_semantics<parallel>], iteration_bounds = array<i64: 1>, scalar_prefetch = 0 : i64, scratch_operands = 0 : i64, tpu.core_type = #tpu.core_type<tc>, window_params = [{transform_indices = @transform_0, window_bounds = array<i64: 8, 16>}, {pipeline_mode = #tpu.pipeline_mode<synchronous>, transform_indices = @transform_1, window_bounds = array<i64: 16, 128>}, {pipeline_mode = #tpu.pipeline_mode<synchronous>, transform_indices = @transform_2, window_bounds = array<i64: 1, 128>}, {pipeline_mode = #tpu.pipeline_mode<synchronous>, transform_indices = @transform_3, window_bounds = array<i64: 128, 128>}, {pipeline_mode = #tpu.pipeline_mode<synchronous>, transform_indices = @transform_4, window_bounds = array<i64: 1, 128>}, {pipeline_mode = #tpu.pipeline_mode<synchronous>, transform_indices = @transform_5, window_bounds = array<i64: 1, 128>}, {transform_indices = @transform_6, window_bounds = array<i64: 8, 128>}]} {
    %c0 = arith.constant 0 : index
    %c0_0 = arith.constant 0 : index
    %0 = vector.load %arg1[%c0, %c0_0] : memref<8x16xbf16, #tpu.memory_space<vmem>>, vector<8x16xbf16>
    %c0_1 = arith.constant 0 : index
    %c0_2 = arith.constant 0 : index
    %1 = vector.load %arg2[%c0_1, %c0_2] : memref<16x128xbf16, #tpu.memory_space<vmem>>, vector<16x128xbf16>
    %cst = arith.constant dense<0.000000e+00> : vector<8x128xf32>
    %2 = tpu.matmul %0, %1, %cst {dimension_numbers = #tpu.dot_dimension_numbers<[1], [0], [0], [1], [0, 0, 1, 1], [], []>} : vector<8x16xbf16>, vector<16x128xbf16>, vector<8x128xf32> -> vector<8x128xf32>
    %c0_3 = arith.constant 0 : index
    %c0_4 = arith.constant 0 : index
    %3 = vector.load %arg3[%c0_3, %c0_4] : memref<1x128xf32, #tpu.memory_space<vmem>>, vector<1x128xf32>
    %4 = vector.broadcast %3 : vector<1x128xf32> to vector<8x128xf32>
    %5 = arith.addf %2, %4 : vector<8x128xf32>
    %cst_5 = arith.constant 0.000000e+00 : f32
    %6 = vector.broadcast %cst_5 : f32 to vector<8x128xf32>
    %7 = arith.maximumf %5, %6 : vector<8x128xf32>
    %8 = arith.truncf %7 : vector<8x128xf32> to vector<8x128xbf16>
    %c0_6 = arith.constant 0 : index
    %c0_7 = arith.constant 0 : index
    %9 = vector.load %arg4[%c0_6, %c0_7] : memref<128x128xbf16, #tpu.memory_space<vmem>>, vector<128x128xbf16>
    %cst_8 = arith.constant dense<0.000000e+00> : vector<8x128xf32>
    %10 = tpu.matmul %8, %9, %cst_8 {dimension_numbers = #tpu.dot_dimension_numbers<[1], [0], [0], [1], [0, 0, 1, 1], [], []>} : vector<8x128xbf16>, vector<128x128xbf16>, vector<8x128xf32> -> vector<8x128xf32>
    %c0_9 = arith.constant 0 : index
    %c0_10 = arith.constant 0 : index
    %11 = vector.load %arg5[%c0_9, %c0_10] : memref<1x128xf32, #tpu.memory_space<vmem>>, vector<1x128xf32>
    %12 = vector.broadcast %11 : vector<1x128xf32> to vector<8x128xf32>
    %13 = arith.addf %10, %12 : vector<8x128xf32>
    %cst_11 = arith.constant 0.000000e+00 : f32
    %14 = vector.broadcast %cst_11 : f32 to vector<8x128xf32>
    %15 = arith.cmpf olt, %13, %14 : vector<8x128xf32>
    %c0_12 = arith.constant 0 : index
    %c0_13 = arith.constant 0 : index
    %16 = vector.load %arg6[%c0_12, %c0_13] : memref<1x128xf32, #tpu.memory_space<vmem>>, vector<1x128xf32>
    %17 = vector.broadcast %16 : vector<1x128xf32> to vector<8x128xf32>
    %18 = arith.mulf %13, %17 : vector<8x128xf32>
    %19 = arith.select %15, %18, %13 : vector<8x128xi1>, vector<8x128xf32>
    %c0_14 = arith.constant 0 : index
    %c0_15 = arith.constant 0 : index
    %20 = vector.load %arg7[%c0_14, %c0_15] : memref<8x128xf32, #tpu.memory_space<vmem>>, vector<8x128xf32>
    tpu.vector_store %arg7[%c0_14, %c0_15], %19 {strides = array<i32>} : memref<8x128xf32, #tpu.memory_space<vmem>>, vector<8x128xf32>,
    return
  }
  func.func @transform_0(%arg0: i32) -> (i32, i32) {
    %c0_i32 = arith.constant 0 : i32
    %c0_i32_0 = arith.constant 0 : i32
    return %arg0, %c0_i32 : i32, i32
  }
  func.func @transform_1(%arg0: i32) -> (i32, i32) {
    %c0_i32 = arith.constant 0 : i32
    %c0_i32_0 = arith.constant 0 : i32
    %c0_i32_1 = arith.constant 0 : i32
    return %c0_i32, %c0_i32_0 : i32, i32
  }
  func.func @transform_2(%arg0: i32) -> (i32, i32) {
    %c0_i32 = arith.constant 0 : i32
    %c0_i32_0 = arith.constant 0 : i32
    %c0_i32_1 = arith.constant 0 : i32
    return %c0_i32, %c0_i32_0 : i32, i32
  }
  func.func @transform_3(%arg0: i32) -> (i32, i32) {
    %c0_i32 = arith.constant 0 : i32
    %c0_i32_0 = arith.constant 0 : i32
    %c0_i32_1 = arith.constant 0 : i32
    return %c0_i32, %c0_i32_0 : i32, i32
  }
  func.func @transform_4(%arg0: i32) -> (i32, i32) {
    %c0_i32 = arith.constant 0 : i32
    %c0_i32_0 = arith.constant 0 : i32
    %c0_i32_1 = arith.constant 0 : i32
    return %c0_i32, %c0_i32_0 : i32, i32
  }
  func.func @transform_5(%arg0: i32) -> (i32, i32) {
    %c0_i32 = arith.constant 0 : i32
    %c0_i32_0 = arith.constant 0 : i32
    %c0_i32_1 = arith.constant 0 : i32
    return %c0_i32, %c0_i32_0 : i32, i32
  }
  func.func @transform_6(%arg0: i32) -> (i32, i32) {
    %c0_i32 = arith.constant 0 : i32
    %c0_i32_0 = arith.constant 0 : i32
    return %arg0, %c0_i32 : i32, i32
  }
}

</mosaic_0001>

<bundles_post_ra>
// kernel: tpu_custom_call.1
= control target key start
LH: loop header
LB: loop body
LE: loop exit
PB: predicated region body
PF: predicated region fallthrough
CT: control target
= control target key end

     0   :  { %11 = vsyncpa [#allocation3], 0  ;;  %s531_s0 = inlined_call_operand.hbm [shape: bf16[8,16], index: 0, kind: input, shape index: {}]   ;;  %s532_s1 = inlined_call_operand.hbm [shape: bf16[16,128], index: 1, kind: input, shape index: {}]   ;;  %s533_s2 = inlined_call_operand.vmem [shape: f32[1,128], index: 2, kind: input, shape index: {}]   ;;  %s534_s3 = inlined_call_operand.hbm [shape: bf16[128,128], index: 3, kind: input, shape index: {}]   ;;  %s535_s4 = inlined_call_operand.vmem [shape: f32[1,128], index: 4, kind: input, shape index: {}]   ;;  %s536_s5 = inlined_call_operand.vmem [shape: f32[1,128], index: 5, kind: input, shape index: {}]   ;;  %s537_s6 = inlined_call_operand.hbm [shape: f32[8,128], index: 6, kind: output, shape index: {}]  }
   0x1   :  { %12 = vsyncpa [#allocation6], 0 }
   0x2   :  { %13 = vsyncpa [#allocation4], 0  ;;  %s425_s21 = smov [#allocation5]   ;;  %s331_s25 = scalar_lea.hbm %s532_s1, 128 }
   0x3   :  { %s29_s22 = sshll.u32 %s425_s21, 4  ;;  %p332_p0 = scmp.ne.s32.totalorder %s532_s1, %s331_s25  ;;  %s30_s22 = int_to_ptr.vmem [resolvable:$true] %s29_s22 }
   0x4   :  { %p335_p1 = scmp.lt.u32.totalorder %s331_s25, %s532_s1 }
   0x6   :  { %p337_p2 = pnand %p335_p1, %p332_p0 }
   0x8   :  { %340 = shalt.err (!%p337_p2)
}
   0x9   :  { %s341_s30 = scalar_lea.vmem %s30_s22, 128  ;;  %p346_p4 = scmp.lt.s32.totalorder %s30_s22, %s30_s22 }
   0xa   :  { %p342_p3 = scmp.ne.s32.totalorder %s30_s22, %s341_s30  ;;  %p347_p5 = scmp.lt.s32.totalorder %s341_s30, %s341_s30 }
   0xc   :  { %p348_p6 = por %p347_p5, %p346_p4 }
   0xe   :  { %p349_p7 = pnand %p348_p6, %p342_p3 }
  0x10   :  { %352 = shalt.err (!%p349_p7)
}
  0x11   :  { %s426_s7 = smov 64   ;;  %s427_s8 = smov 4  }
  0x12   :  { %35 = dma.hbm_to_vmem [thread:$0]  %s532_s1, 128, %s30_s22, [#allocation6], %s426_s7, %s426_s7, %s427_s8  }
  0x13   :  { %s428_s11 = smov [#allocation2]   ;;  %s429_s13 = smov [#allocation7]  }
  0x14   :  { %s20_s12 = sshll.u32 %s428_s11, 4  ;;  %s43_s14 = sshll.u32 %s429_s13, 4  ;;  %s21_s12 = int_to_ptr.vmem [resolvable:$true] %s20_s12  ;;  %s44_s14 = int_to_ptr.vmem [resolvable:$true] %s43_s14 }
  0x15   :  { %s353_s17 = scalar_lea.hbm %s531_s0, 64 }
  0x16   :  { %p354_p8 = scmp.ne.s32.totalorder %s531_s0, %s353_s17  ;;  %p357_p9 = scmp.lt.u32.totalorder %s353_s17, %s531_s0 }
  0x18   :  { %p359_p10 = pnand %p357_p9, %p354_p8 }
  0x1a   :  { %362 = shalt.err (!%p359_p10)
}
  0x1b   :  { %s363_s1 = scalar_lea.vmem %s21_s12, 64  ;;  %p368_p12 = scmp.lt.s32.totalorder %s21_s12, %s21_s12 }
  0x1c   :  { %p364_p11 = scmp.ne.s32.totalorder %s21_s12, %s363_s1  ;;  %p369_p13 = scmp.lt.s32.totalorder %s363_s1, %s363_s1 }
  0x1e   :  { %p370_p0 = por %p369_p13, %p368_p12 }
  0x20   :  { %p371_p1 = pnand %p370_p0, %p364_p11 }
  0x22   :  { %374 = shalt.err (!%p371_p1)
}
  0x23   :  { %23 = dma.hbm_to_vmem [thread:$0]  %s531_s0, 64, %s21_s12, [#allocation3]  }
  0x24   :  { %s375_s26 = scalar_lea.hbm %s534_s3, 1024 }
  0x25   :  { %p376_p2 = scmp.ne.s32.totalorder %s534_s3, %s375_s26  ;;  %p379_p3 = scmp.lt.u32.totalorder %s375_s26, %s534_s3 }
  0x27   :  { %p381_p4 = pnand %p379_p3, %p376_p2 }
  0x29   :  { %384 = shalt.err (!%p381_p4)
}
  0x2a   :  { %s385_s9 = scalar_lea.vmem %s44_s14, 1024  ;;  %p390_p6 = scmp.lt.s32.totalorder %s44_s14, %s44_s14 }
  0x2b   :  { %p386_p5 = scmp.ne.s32.totalorder %s44_s14, %s385_s9  ;;  %p391_p7 = scmp.lt.s32.totalorder %s385_s9, %s385_s9 }
  0x2d   :  { %p392_p8 = por %p391_p7, %p390_p6 }
  0x2f   :  { %p393_p9 = pnand %p392_p8, %p386_p5 }
  0x31   :  { %396 = shalt.err (!%p393_p9)
}
  0x32   :  { %49 = dma.hbm_to_vmem [thread:$0]  %s534_s3, 1024, %s44_s14, [#allocation6], %s426_s7, %s426_s7, %s427_s8  }
  0x33   :  { %419 = dma.done.wait [#allocation3], 64  }
  0x34   :  { %420 = vsyncadd [#allocation3], 4294967232 }
  0x35   :  { %421 = dma.done.wait [#allocation6], 1152  }
  0x36   :  { %422 = vsyncadd [#allocation6], 4294966144  ;;  %v430_v0 = vmov 0.0   ;;  %vm431_vm0 = vmmov 0   ;;  %v322_v1 = vld [vmem:[#allocation5] sm:$0xff]   ;;  %vm80_vm1 = vcmask 130048  }
  0x37   :  { %288 = vmatprep.subr.bf16.mxu0 %v430_v0  ;;  %290 = vmatprep.mubr.msk.bf16.mxu0 %vm431_vm0, %v430_v0  ;;  %v64_v2 = vld [vmem:[#allocation2] sm:$0xf]  ;;  %v323_v3 = vld [vmem:[#allocation7] sm:$0xff]   ;;  %v324_v4 = vld [vmem:[#allocation7 + $0x8] sm:$0xff]  }
  0x38   :  { %294 = vmatprep.subr.bf16.mxu1 %v430_v0  ;;  %310 = vmatprep.mubr.msk.bf16.mxu1 %vm431_vm0, %v430_v0  ;;  %v325_v5 = vld [vmem:[#allocation7 + $0x10] sm:$0xff]   ;;  %v326_v6 = vld [vmem:[#allocation7 + $0x18] sm:$0xff]   ;;  %v327_v7 = vld [vmem:[#allocation7 + $0x20] sm:$0xff]  }
  0x39   :  { %289 = vmatpush3.bf16.msra.mxu0 %v322_v1  ;;  %295 = vmatpush3.bf16.msra.mxu1 %v323_v3  ;;  %v328_v8 = vld [vmem:[#allocation7 + $0x28] sm:$0xff]   ;;  %v329_v9 = vld [vmem:[#allocation7 + $0x30] sm:$0xff]   ;;  %v330_v10 = vld [vmem:[#allocation7 + $0x38] sm:$0xff]  }
  0x3a   :  { %296 = vmatprep.subr.bf16.mxu1 %v430_v0  ;;  %v264_v11 = vld [vmem:[%s533_s2] ss:$0 sm:$0xff]  ;;  %s432_s2 = smov [#allocation8]  }
  0x3b   :  { %v267_v19 = vld [vmem:[%s535_s4] ss:$0 sm:$0xff]  ;;  %s254_s14 = sshll.u32 %s432_s2, 4  ;;  %s255_s14 = int_to_ptr.vmem [resolvable:$true] %s254_s14 }
  0x3c   :  { %291 = vmatmul.mubr.msk.bf16.vlgmr.msra.gmra.mrb[0].mxu0 %vm80_vm1, %v64_v2  ;;  %v276_v21 = vld [vmem:[%s536_s5] ss:$0 sm:$0xff]  ;;  %s397_s15 = scalar_lea.vmem %s255_s14, 128  ;;  %p402_p11 = scmp.lt.s32.totalorder %s255_s14, %s255_s14 }
  0x3d   :  { %297 = vmatpush3.bf16.msra.mxu1 %v324_v4  ;;  %p398_p10 = scmp.ne.s32.totalorder %s255_s14, %s397_s15  ;;  %p403_p12 = scmp.lt.s32.totalorder %s397_s15, %s397_s15 }
  0x3e   :  { %298 = vmatprep.subr.bf16.mxu1 %v430_v0 }
  0x3f   :  { %p404_p13 = por %p403_p12, %p402_p11 }
  0x41   :  { %299 = vmatpush3.bf16.msra.mxu1 %v325_v5  ;;  %p405_p0 = pnand %p404_p13, %p398_p10 }
  0x42   :  { %300 = vmatprep.subr.bf16.mxu1 %v430_v0 }
  0x45   :  { %301 = vmatpush3.bf16.msra.mxu1 %v326_v6 }
  0x46   :  { %302 = vmatprep.subr.bf16.mxu1 %v430_v0 }
  0x49   :  { %303 = vmatpush3.bf16.msra.mxu1 %v327_v7 }
  0x4a   :  { %304 = vmatprep.subr.bf16.mxu1 %v430_v0 }
  0x4d   :  { %305 = vmatpush3.bf16.msra.mxu1 %v328_v8 }
  0x4e   :  { %306 = vmatprep.subr.bf16.mxu1 %v430_v0 }
  0x51   :  { %307 = vmatpush3.bf16.msra.mxu1 %v329_v9 }
  0x52   :  { %308 = vmatprep.subr.bf16.mxu1 %v430_v0 }
  0x55   :  { %309 = vmatpush3.bf16.msra.mxu1 %v330_v10 }
 0x10f   :  { %v118_v12 = vpop.f32.mrb[0].mxu0 }
 0x110   :  { %v119_v13 = vadd.f32 %v264_v11, %v118_v12  ;;  %v292_v14 = vpop.f32.mrb[1].mxu0 }
 0x111   :  { %v121_v15 = vpop.f32.mrb[2].mxu0 }
 0x112   :  { %v124_v16 = vmax.f32 %v119_v13, 0.0  ;;  %v293_v17 = vpop.f32.mrb[3].mxu0 }
 0x114   :  { %v125_v18 = vpack.c.bf16 %v124_v16, %v124_v16 }
 0x116   :  { %311 = vmatmul.mubr.bf16.vlgmr.msra.gmra.mrb[0].mxu1 %v125_v18 }
 0x1e9   :  { %v231_v20 = vpop.f32.mrb[0].mxu1 }
 0x1ea   :  { %v232_v22 = vadd.f32 %v267_v19, %v231_v20  ;;  %v312_v23 = vpop.f32.mrb[1].mxu1 }
 0x1eb   :  { %v234_v24 = vpop.f32.mrb[2].mxu1 }
 0x1ec   :  { %v245_v25 = vmul.f32 %v276_v21, %v232_v22  ;;  %v313_v26 = vpop.f32.mrb[3].mxu1  ;;  %vm237_vm2 = vcmp.lt.f32.partialorder %v232_v22, 0.0 }
 0x1ee   :  { %v246_v27 = vsel %vm237_vm2, %v245_v25, %v232_v22 }
 0x1ef   :  { %247 = vst [vmem:[#allocation8] sm:$0xff] %v246_v27 }
 0x1f0   :  { %408 = shalt.err (!%p405_p0)
}
 0x1f1   :  { %s409_s16 = scalar_lea.hbm %s537_s6, 128 }
 0x1f2   :  { %p410_p1 = scmp.ne.s32.totalorder %s537_s6, %s409_s16  ;;  %p413_p2 = scmp.lt.u32.totalorder %s409_s16, %s537_s6 }
 0x1f4   :  { %p415_p3 = pnand %p413_p2, %p410_p1 }
 0x1f6   :  { %418 = shalt.err (!%p415_p3)
}
 0x1f7   :  { %257 = dma.vmem_to_hbm [thread:$0]  %s255_s14, 128, %s537_s6, [#allocation4]  }
 0x1f8   :  { %423 = dma.done.wait [#allocation4], 128  }
 0x1f9   :  { %424 = vsyncadd [#allocation4], 4294967168 }
 0x1fa   :  { %261 = vsyncpa [#allocation3], 1 }
 0x1fb   :  { %262 = vsyncpa [#allocation6], 1 }
 0x1fc   :  { %263 = vsyncpa [#allocation4], 1 }

</bundles_post_ra>
